<compile_context>
chip_gen: v7x
topology: tpu7x:2x2x1
jax: 0.10.0
libtpu: 0.0.40
codegen_flags: <defaults>
</compile_context>

<pallas_src>
import functools

import jax
import jax.numpy as jnp
from jax.experimental import pallas as pl
from jax.experimental.pallas import tpu as pltpu

EPS = 1e-5          # nn.BatchNorm2d default
STAT_LANES = 128    # width of the lane-partial statistics accumulators


# ----------------------------------------------------------------------------- helpers --
def _accum_lane_partials(v, s_ref, q_ref):
    """Accumulate sum / sum-of-squares of v [C, TP] into [C, STAT_LANES] lane partials.

    Uses only elementwise VPU adds over 128-lane-aligned static slices (vreg views, no
    relayout, no per-tile XLU tree reduction).  The single cross-lane reduction happens
    later in _fold_coeffs.
    """
    lanes = s_ref.shape[-1]
    tp = v.shape[-1]
    s = s_ref[...]
    q = q_ref[...]
    if tp % lanes == 0:
        for k in range(0, tp, lanes):
            c = v[:, k:k + lanes]
            s = s + c
            q = q + c * c
    else:
        # Ragged spatial size: fall back to one XLU reduction folded into lane 0.
        pad = ((0, 0), (0, lanes - 1))
        s = s + jnp.pad(jnp.sum(v, axis=1, keepdims=True), pad)
        q = q + jnp.pad(jnp.sum(v * v, axis=1, keepdims=True), pad)
    s_ref[...] = s
    q_ref[...] = q


def _fold_coeffs(s_partial, q_partial, gamma, beta, inv_p):
    """[C, STAT_LANES] partial sums -> per-channel FMA coefficients (a, c), all f32."""
    m = jnp.sum(s_partial, axis=1, keepdims=True) * inv_p
    v = jnp.sum(q_partial, axis=1, keepdims=True) * inv_p - m * m
    v = jnp.maximum(v, 0.0)                 # one-pass E[x^2]-E[x]^2 can dip slightly < 0
    a = gamma * jax.lax.rsqrt(v + EPS)
    return a, beta - m * a


# ----------------------------------------------------------------------------- kernels --
def _stats_compute_kernel(x_ref, w1_ref, g1_ref, be1_ref, w2_ref,
                          yraw_ref, s2_ref, q2_ref,
                          s1_ref, q1_ref, a1_ref, c1_ref, *, inv_p):
    """Kernel A.  Grid (phase, batch, pixel_tile); phase 0 = BN1 stats, phase 1 = compute.

    x_ref:    [Cin, TP]  compute dtype        w1_ref: [Cmid, Cin]   w2_ref: [Cout, Cmid]
    g1/be1:   [Cmid, 1] f32
    yraw_ref: [Cout, TP] output — pre-BN2 activations, folded in place by kernel B
    s2/q2:    [Cout, STAT_LANES] f32 outputs — BN2 lane-partial sum / sumsq (resident)
    s1/q1:    [Cmid, STAT_LANES] f32 scratch   a1/c1: [Cmid, 1] f32 scratch (hoisted fold)
    """
    ph = pl.program_id(0)
    first_tile = jnp.logical_and(pl.program_id(1) == 0, pl.program_id(2) == 0)

    @pl.when(jnp.logical_and(ph == 0, first_tile))
    def _init():
        s1_ref[...] = jnp.zeros_like(s1_ref)
        q1_ref[...] = jnp.zeros_like(q1_ref)
        s2_ref[...] = jnp.zeros_like(s2_ref)
        q2_ref[...] = jnp.zeros_like(q2_ref)

    # conv1 (1x1), channel-major: [Cmid, Cin] @ [Cin, TP] on the MXU, f32 accumulate.
    # Conv bias omitted: cancelled exactly by the training-mode BN mean subtraction.
    h = jnp.dot(w1_ref[...], x_ref[...], preferred_element_type=jnp.float32)   # [Cmid, TP]

    @pl.when(ph == 0)
    def _bn1_stats():
        _accum_lane_partials(h, s1_ref, q1_ref)

    @pl.when(ph == 1)
    def _compute():
        # Hoist the BN1 fold coefficients: computed once, at the first compute-phase tile.
        @pl.when(first_tile)
        def _fold1():
            a1, c1 = _fold_coeffs(s1_ref[...], q1_ref[...],
                                  g1_ref[...], be1_ref[...], inv_p)
            a1_ref[...] = a1
            c1_ref[...] = c1

        hn = jnp.maximum(h * a1_ref[...] + c1_ref[...], 0.0)            # BN1 + ReLU (f32)
        # conv2 (1x1): [Cout, Cmid] @ [Cmid, TP]; operands in compute dtype, f32 result.
        y = jnp.dot(w2_ref[...], hn.astype(w2_ref.dtype),
                    preferred_element_type=jnp.float32)                 # [Cout, TP]
        yraw_ref[...] = y.astype(yraw_ref.dtype)                        # lane-dense stash
        _accum_lane_partials(y, s2_ref, q2_ref)                         # stats from f32 y


def _bn2_fold_kernel(s2_ref, q2_ref, g2_ref, be2_ref, y_ref, o_ref, *, inv_p):
    """Kernel B.  Grid (batch, pixel_tile): in-place BN2 fold over the stashed y_raw.

    The fold coefficients are recomputed per tile (one 128-lane reduce + rsqrt on [Cout,1]
    — negligible next to the [Cout, TP] stream), so there is no carried state and both
    grid axes can be marked "parallel" (megacore-shardable).
    """
    a2, c2 = _fold_coeffs(s2_ref[...], q2_ref[...], g2_ref[...], be2_ref[...], inv_p)
    o_ref[...] = (y_ref[...] * a2 + c2).astype(o_ref.dtype)


# ----------------------------------------------------------------------- tiling / VMEM --
def _vmem_capacity_bytes():
    try:
        return int(pltpu.get_tpu_info().vmem_capacity_bytes)
    except Exception:
        return 64 * 1024 * 1024       # conservative fallback (v7x per-TensorCore VMEM)


def _pick_pixel_tile(hw, cin, cmid, cout, x_bytes, budget_bytes):
    """Largest lane-dense tile (multiple of 128) dividing H*W whose working set fits."""
    # Per-pixel bytes: double-buffered x block + double-buffered y_raw block + the f32
    # intermediates h / hn / y held live inside the body.
    per_px = 2 * cin * x_bytes + 2 * cout * 4 + (2 * cmid + cout) * 4
    for cand in (4096, 2048, 1024, 512, 256, 128):
        if hw % cand == 0 and cand * per_px <= budget_bytes:
            return cand
    return hw   # full spatial extent (block dim == array dim is always legal)


# ----------------------------------------------------------------------------- wrapper --
def projection_head(x_nchw, params, *, compute_dtype=jnp.bfloat16):
    """x_nchw: [N, Cin, H, W] float32 -> [N, Cout, H, W] (training-mode BatchNorm)."""
    w1, b1, g1, be1, w2, b2, g2, be2 = params
    del b1, b2      # cancel exactly under training-mode BN (batch-mean subtraction)
    N, Cin, H, W = x_nchw.shape
    Cmid, Cout = w1.shape[0], w2.shape[0]
    HW = H * W
    inv_p = 1.0 / (N * HW)

    vmem_cap = _vmem_capacity_bytes()
    vmem_limit = min(int(vmem_cap * 0.75), 96 * 1024 * 1024)   # 96 MiB v5e/v6e, 48 MiB v7x
    x_bytes = jnp.dtype(compute_dtype).itemsize
    TP = _pick_pixel_tile(HW, Cin, Cmid, Cout, x_bytes, vmem_limit // 2)
    n_tiles = HW // TP

    # Channel-major views: NCHW is already [C, H*W]-contiguous per image -> no transpose.
    # Matmul operands are cast to the compute dtype (bf16 by default) once, here.
    x3 = x_nchw.reshape(N, Cin, HW).astype(compute_dtype)
    w1c = w1.astype(compute_dtype)
    w2c = w2.astype(compute_dtype)

    const = lambda shape: pl.BlockSpec(shape, lambda *_: (0,) * len(shape))

    # --- Kernel A: BN1-stats pass + compute pass (stashes y_raw + BN2 lane partials). ----
    yraw, s2, q2 = pl.pallas_call(
        functools.partial(_stats_compute_kernel, inv_p=inv_p),
        out_shape=(
            jax.ShapeDtypeStruct((N, Cout, HW), x_nchw.dtype),        # y_raw (pre-BN2)
            jax.ShapeDtypeStruct((Cout, STAT_LANES), jnp.float32),    # BN2 sum partials
            jax.ShapeDtypeStruct((Cout, STAT_LANES), jnp.float32),    # BN2 sumsq partials
        ),
        grid=(2, N, n_tiles),                                         # (phase, batch, tile)
        in_specs=[
            pl.BlockSpec((pl.Squeezed(), Cin, TP), lambda ph, n, t: (n, 0, t)),
            const((Cmid, Cin)),
            const((Cmid, 1)), const((Cmid, 1)),
            const((Cout, Cmid)),
        ],
        out_specs=(
            # Pinned to block (0,0,0) during the stats phase (ph=0): the block index never
            # changes there, so nothing is written back until phase 1 has overwritten it.
            # NOTE: relies on phase 1 starting at (n=0, t=0) — the natural grid order.
            pl.BlockSpec((pl.Squeezed(), Cout, TP), lambda ph, n, t: (ph * n, 0, ph * t)),
            const((Cout, STAT_LANES)),      # constant index -> resident accumulator
            const((Cout, STAT_LANES)),
        ),
        scratch_shapes=[
            pltpu.VMEM((Cmid, STAT_LANES), jnp.float32),   # BN1 sum partials
            pltpu.VMEM((Cmid, STAT_LANES), jnp.float32),   # BN1 sumsq partials
            pltpu.VMEM((Cmid, 1), jnp.float32),            # hoisted a1
            pltpu.VMEM((Cmid, 1), jnp.float32),            # hoisted c1
        ],
        compiler_params=pltpu.CompilerParams(
            # All axes carry the statistics accumulators -> sequential.
            dimension_semantics=("arbitrary", "arbitrary", "arbitrary"),
            vmem_limit_bytes=vmem_limit,
        ),
    )(x3, w1c, g1, be1, w2c)

    # --- Kernel B: BN2 fold over the stashed y_raw, in place on the final output. --------
    out3 = pl.pallas_call(
        functools.partial(_bn2_fold_kernel, inv_p=inv_p),
        out_shape=jax.ShapeDtypeStruct((N, Cout, HW), x_nchw.dtype),
        grid=(N, n_tiles),
        in_specs=[
            const((Cout, STAT_LANES)), const((Cout, STAT_LANES)),
            const((Cout, 1)), const((Cout, 1)),
            pl.BlockSpec((pl.Squeezed(), Cout, TP), lambda n, t: (n, 0, t)),
        ],
        out_specs=pl.BlockSpec((pl.Squeezed(), Cout, TP), lambda n, t: (n, 0, t)),
        input_output_aliases={4: 0},     # fold y_raw in place (same block, same grid step)
        compiler_params=pltpu.CompilerParams(
            dimension_semantics=("parallel", "parallel"),
            vmem_limit_bytes=vmem_limit,
        ),
    )(s2, q2, g2, be2, yraw)

    return out3.reshape(N, Cout, H, W)


# ---------------------------------------------------------------------- params / check --
def init_params(key, in_channels, intermediate_channels, out_channels):
    """Deterministic synthetic init (shapes match nn.Conv2d(k=1) / nn.BatchNorm2d)."""
    k1, k2, k3, k4 = jax.random.split(key, 4)
    scale1 = 1.0 / jnp.sqrt(in_channels)
    scale2 = 1.0 / jnp.sqrt(intermediate_channels)
    # conv weights stored channel-major for the kernel: [C_out_layer, C_in_layer]
    w1 = jax.random.uniform(k1, (intermediate_channels, in_channels),
                            jnp.float32, -scale1, scale1)
    b1 = jax.random.uniform(k2, (intermediate_channels, 1), jnp.float32, -scale1, scale1)
    w2 = jax.random.uniform(k3, (out_channels, intermediate_channels),
                            jnp.float32, -scale2, scale2)
    b2 = jax.random.uniform(k4, (out_channels, 1), jnp.float32, -scale2, scale2)
    # BatchNorm affine params at PyTorch defaults (gamma=1, beta=0)
    g1 = jnp.ones((intermediate_channels, 1), jnp.float32)
    be1 = jnp.zeros((intermediate_channels, 1), jnp.float32)
    g2 = jnp.ones((out_channels, 1), jnp.float32)
    be2 = jnp.zeros((out_channels, 1), jnp.float32)
    return (w1, b1, g1, be1, w2, b2, g2, be2)


def reference(x_nchw, params):
    """Pure-JAX f32 reference of the PyTorch forward (training-mode BN, WITH conv biases)."""
    w1, b1, g1, be1, w2, b2, g2, be2 = params
    N, Cin, H, W = x_nchw.shape
    x = x_nchw.reshape(N, Cin, H * W)
    h = jnp.einsum('mc,ncp->nmp', w1, x) + b1[None]
    m = h.mean(axis=(0, 2), keepdims=True)
    v = ((h - m) ** 2).mean(axis=(0, 2), keepdims=True)
    h = (h - m) / jnp.sqrt(v + EPS) * g1[None] + be1[None]
    h = jnp.maximum(h, 0.0)
    y = jnp.einsum('om,nmp->nop', w2, h) + b2[None]
    m = y.mean(axis=(0, 2), keepdims=True)
    v = ((y - m) ** 2).mean(axis=(0, 2), keepdims=True)
    y = (y - m) / jnp.sqrt(v + EPS) * g2[None] + be2[None]
    return y.reshape(N, -1, H, W)


if __name__ == "__main__":
    key = jax.random.PRNGKey(0)
    kx, kp = jax.random.split(key)

    N, Cin, H, W = 2, 4, 16, 16
    Cmid, Cout = 8, 16

    x = jax.random.normal(kx, (N, Cin, H, W), jnp.float32)
    params = init_params(kp, Cin, Cmid, Cout)
    ref = reference(x, params)

    # Structural check: f32 MXU operands must match the f32 reference tightly
    # (also verifies the conv-bias / batch-mean cancellation).
    out_f32 = jax.jit(functools.partial(projection_head, compute_dtype=jnp.float32))(x, params)
    out_f32 = jax.block_until_ready(out_f32)
    assert out_f32.shape == (N, Cout, H, W), out_f32.shape
    err_f32 = float(jnp.max(jnp.abs(out_f32 - ref)))
    assert jnp.allclose(out_f32, ref, atol=1e-4, rtol=1e-4), err_f32

    # Production path: bf16 MXU operands (stats / folds stay f32) -> looser tolerance.
    out_bf16 = jax.block_until_ready(jax.jit(projection_head)(x, params))
    assert out_bf16.shape == (N, Cout, H, W), out_bf16.shape
    err_bf16 = float(jnp.max(jnp.abs(out_bf16 - ref)))
    assert jnp.allclose(out_bf16, ref, atol=1e-1, rtol=5e-2), err_bf16

    print("KERNEL_OK")
</pallas_src>

<mosaic_0001>
module attributes {stable_mosaic.version = 11 : i64} {
  func.func @_stats_compute_kernel(%arg0: i32, %arg1: i32, %arg2: i32, %arg3: memref<1x4x256xf32, #tpu.memory_space<vmem>>, %arg4: memref<8x4xf32, #tpu.memory_space<vmem>>, %arg5: memref<8x1xf32, #tpu.memory_space<vmem>>, %arg6: memref<8x1xf32, #tpu.memory_space<vmem>>, %arg7: memref<16x8xf32, #tpu.memory_space<vmem>>, %arg8: memref<1x16x256xf32, #tpu.memory_space<vmem>>, %arg9: memref<16x128xf32, #tpu.memory_space<vmem>>, %arg10: memref<16x128xf32, #tpu.memory_space<vmem>>, %arg11: memref<8x128xf32, #tpu.memory_space<vmem>>, %arg12: memref<8x128xf32, #tpu.memory_space<vmem>>, %arg13: memref<8x1xf32, #tpu.memory_space<vmem>>, %arg14: memref<8x1xf32, #tpu.memory_space<vmem>>) attributes {dimension_semantics = [#tpu.dimension_semantics<arbitrary>, #tpu.dimension_semantics<arbitrary>, #tpu.dimension_semantics<arbitrary>], iteration_bounds = array<i64: 2, 2, 1>, scalar_prefetch = 0 : i64, scratch_operands = 4 : i64, tpu.core_type = #tpu.core_type<tc>, window_params = [{transform_indices = @transform_0, window_bounds = array<i64: 1, 4, 256>}, {pipeline_mode = #tpu.pipeline_mode<synchronous>, transform_indices = @transform_1, window_bounds = array<i64: 8, 4>}, {pipeline_mode = #tpu.pipeline_mode<synchronous>, transform_indices = @transform_2, window_bounds = array<i64: 8, 1>}, {pipeline_mode = #tpu.pipeline_mode<synchronous>, transform_indices = @transform_3, window_bounds = array<i64: 8, 1>}, {pipeline_mode = #tpu.pipeline_mode<synchronous>, transform_indices = @transform_4, window_bounds = array<i64: 16, 8>}, {transform_indices = @transform_5, window_bounds = array<i64: 1, 16, 256>}, {pipeline_mode = #tpu.pipeline_mode<synchronous>, transform_indices = @transform_6, window_bounds = array<i64: 16, 128>}, {pipeline_mode = #tpu.pipeline_mode<synchronous>, transform_indices = @transform_7, window_bounds = array<i64: 16, 128>}]} {
    %c0_i32 = arith.constant 0 : i32
    %0 = arith.cmpi eq, %arg1, %c0_i32 : i32
    %c0_i32_0 = arith.constant 0 : i32
    %1 = arith.cmpi eq, %arg2, %c0_i32_0 : i32
    %2 = arith.andi %0, %1 : i1
    %c0_i32_1 = arith.constant 0 : i32
    %3 = arith.cmpi eq, %arg0, %c0_i32_1 : i32
    %4 = arith.andi %3, %2 : i1
    %5 = arith.extui %4 : i1 to i32
    %c0_i32_2 = arith.constant 0 : i32
    %6 = arith.cmpi ne, %5, %c0_i32_2 : i32
    scf.if %6 {
      %cst_10 = arith.constant 0.000000e+00 : f32
      %17 = vector.broadcast %cst_10 : f32 to vector<8x128xf32>
      %c0_11 = arith.constant 0 : index
      %c0_12 = arith.constant 0 : index
      %18 = vector.load %arg11[%c0_11, %c0_12] : memref<8x128xf32, #tpu.memory_space<vmem>>, vector<8x128xf32>
      tpu.vector_store %arg11[%c0_11, %c0_12], %17 {strides = array<i32>} : memref<8x128xf32, #tpu.memory_space<vmem>>, vector<8x128xf32>,
      %cst_13 = arith.constant 0.000000e+00 : f32
      %19 = vector.broadcast %cst_13 : f32 to vector<8x128xf32>
      %c0_14 = arith.constant 0 : index
      %c0_15 = arith.constant 0 : index
      %20 = vector.load %arg12[%c0_14, %c0_15] : memref<8x128xf32, #tpu.memory_space<vmem>>, vector<8x128xf32>
      tpu.vector_store %arg12[%c0_14, %c0_15], %19 {strides = array<i32>} : memref<8x128xf32, #tpu.memory_space<vmem>>, vector<8x128xf32>,
      %cst_16 = arith.constant 0.000000e+00 : f32
      %21 = vector.broadcast %cst_16 : f32 to vector<16x128xf32>
      %c0_17 = arith.constant 0 : index
      %c0_18 = arith.constant 0 : index
      %22 = vector.load %arg9[%c0_17, %c0_18] : memref<16x128xf32, #tpu.memory_space<vmem>>, vector<16x128xf32>
      tpu.vector_store %arg9[%c0_17, %c0_18], %21 {strides = array<i32>} : memref<16x128xf32, #tpu.memory_space<vmem>>, vector<16x128xf32>,
      %cst_19 = arith.constant 0.000000e+00 : f32
      %23 = vector.broadcast %cst_19 : f32 to vector<16x128xf32>
      %c0_20 = arith.constant 0 : index
      %c0_21 = arith.constant 0 : index
      %24 = vector.load %arg10[%c0_20, %c0_21] : memref<16x128xf32, #tpu.memory_space<vmem>>, vector<16x128xf32>
      tpu.vector_store %arg10[%c0_20, %c0_21], %23 {strides = array<i32>} : memref<16x128xf32, #tpu.memory_space<vmem>>, vector<16x128xf32>,
    } else {
    }
    %c0 = arith.constant 0 : index
    %c0_3 = arith.constant 0 : index
    %7 = vector.load %arg4[%c0, %c0_3] : memref<8x4xf32, #tpu.memory_space<vmem>>, vector<8x4xf32>
    %c0_4 = arith.constant 0 : index
    %c0_5 = arith.constant 0 : index
    %c0_6 = arith.constant 0 : index
    %8 = vector.load %arg3[%c0_4, %c0_5, %c0_6] : memref<1x4x256xf32, #tpu.memory_space<vmem>>, vector<1x4x256xf32>
    %9 = vector.shape_cast %8 : vector<1x4x256xf32> to vector<4x256xf32>
    %cst = arith.constant dense<0.000000e+00> : vector<8x256xf32>
    %10 = tpu.matmul %7, %9, %cst {dimension_numbers = #tpu.dot_dimension_numbers<[1], [0], [0], [1], [0, 0, 1, 1], [], []>} : vector<8x4xf32>, vector<4x256xf32>, vector<8x256xf32> -> vector<8x256xf32>
    %c0_i32_7 = arith.constant 0 : i32
    %11 = arith.cmpi eq, %arg0, %c0_i32_7 : i32
    %12 = arith.extui %11 : i1 to i32
    %c0_i32_8 = arith.constant 0 : i32
    %13 = arith.cmpi ne, %12, %c0_i32_8 : i32
    scf.if %13 {
      %c0_10 = arith.constant 0 : index
      %c0_11 = arith.constant 0 : index
      %17 = vector.load %arg11[%c0_10, %c0_11] : memref<8x128xf32, #tpu.memory_space<vmem>>, vector<8x128xf32>
      %c0_12 = arith.constant 0 : index
      %c0_13 = arith.constant 0 : index
      %18 = vector.load %arg12[%c0_12, %c0_13] : memref<8x128xf32, #tpu.memory_space<vmem>>, vector<8x128xf32>
      %19 = vector.extract_strided_slice %10 {offsets = [0, 0], sizes = [8, 128], strides = [1, 1]} : vector<8x256xf32> to vector<8x128xf32>
      %20 = arith.addf %17, %19 : vector<8x128xf32>
      %21 = arith.mulf %19, %19 : vector<8x128xf32>
      %22 = arith.addf %18, %21 : vector<8x128xf32>
      %23 = vector.extract_strided_slice %10 {offsets = [0, 128], sizes = [8, 128], strides = [1, 1]} : vector<8x256xf32> to vector<8x128xf32>
      %24 = arith.addf %20, %23 : vector<8x128xf32>
      %25 = arith.mulf %23, %23 : vector<8x128xf32>
      %26 = arith.addf %22, %25 : vector<8x128xf32>
      %c0_14 = arith.constant 0 : index
      %c0_15 = arith.constant 0 : index
      %27 = vector.load %arg11[%c0_14, %c0_15] : memref<8x128xf32, #tpu.memory_space<vmem>>, vector<8x128xf32>
      tpu.vector_store %arg11[%c0_14, %c0_15], %24 {strides = array<i32>} : memref<8x128xf32, #tpu.memory_space<vmem>>, vector<8x128xf32>,
      %c0_16 = arith.constant 0 : index
      %c0_17 = arith.constant 0 : index
      %28 = vector.load %arg12[%c0_16, %c0_17] : memref<8x128xf32, #tpu.memory_space<vmem>>, vector<8x128xf32>
      tpu.vector_store %arg12[%c0_16, %c0_17], %26 {strides = array<i32>} : memref<8x128xf32, #tpu.memory_space<vmem>>, vector<8x128xf32>,
    } else {
    }
    %c1_i32 = arith.constant 1 : i32
    %14 = arith.cmpi eq, %arg0, %c1_i32 : i32
    %15 = arith.extui %14 : i1 to i32
    %c0_i32_9 = arith.constant 0 : i32
    %16 = arith.cmpi ne, %15, %c0_i32_9 : i32
    scf.if %16 {
      %17 = arith.extui %2 : i1 to i32
      %c0_i32_10 = arith.constant 0 : i32
      %18 = arith.cmpi ne, %17, %c0_i32_10 : i32
      scf.if %18 {
        %c0_30 = arith.constant 0 : index
        %c0_31 = arith.constant 0 : index
        %44 = vector.load %arg11[%c0_30, %c0_31] : memref<8x128xf32, #tpu.memory_space<vmem>>, vector<8x128xf32>
        %c0_32 = arith.constant 0 : index
        %c0_33 = arith.constant 0 : index
        %45 = vector.load %arg12[%c0_32, %c0_33] : memref<8x128xf32, #tpu.memory_space<vmem>>, vector<8x128xf32>
        %c0_34 = arith.constant 0 : index
        %c0_35 = arith.constant 0 : index
        %46 = vector.load %arg5[%c0_34, %c0_35] : memref<8x1xf32, #tpu.memory_space<vmem>>, vector<8x1xf32>
        %c0_36 = arith.constant 0 : index
        %c0_37 = arith.constant 0 : index
        %47 = vector.load %arg6[%c0_36, %c0_37] : memref<8x1xf32, #tpu.memory_space<vmem>>, vector<8x1xf32>
        %cst_38 = arith.constant dense<0.000000e+00> : vector<8xf32>
        %48 = vector.multi_reduction <add>, %44, %cst_38 [1] : vector<8x128xf32> to vector<8xf32>
        %49 = vector.shape_cast %48 : vector<8xf32> to vector<8x1xf32>
        %cst_39 = arith.constant 0.001953125 : f32
        %50 = vector.broadcast %cst_39 : f32 to vector<8x1xf32>
        %51 = arith.mulf %49, %50 : vector<8x1xf32>
        %cst_40 = arith.constant dense<0.000000e+00> : vector<8xf32>
        %52 = vector.multi_reduction <add>, %45, %cst_40 [1] : vector<8x128xf32> to vector<8xf32>
        %53 = vector.shape_cast %52 : vector<8xf32> to vector<8x1xf32>
        %cst_41 = arith.constant 0.001953125 : f32
        %54 = vector.broadcast %cst_41 : f32 to vector<8x1xf32>
        %55 = arith.mulf %53, %54 : vector<8x1xf32>
        %56 = arith.mulf %51, %51 : vector<8x1xf32>
        %57 = arith.subf %55, %56 : vector<8x1xf32>
        %cst_42 = arith.constant 0.000000e+00 : f32
        %58 = vector.broadcast %cst_42 : f32 to vector<8x1xf32>
        %59 = arith.maximumf %57, %58 : vector<8x1xf32>
        %cst_43 = arith.constant 9.99999974E-6 : f32
        %60 = vector.broadcast %cst_43 : f32 to vector<8x1xf32>
        %61 = arith.addf %59, %60 : vector<8x1xf32>
        %62 = math.rsqrt %61 : vector<8x1xf32>
        %63 = arith.mulf %46, %62 : vector<8x1xf32>
        %64 = arith.mulf %51, %63 : vector<8x1xf32>
        %65 = arith.subf %47, %64 : vector<8x1xf32>
        %c0_44 = arith.constant 0 : index
        %c0_45 = arith.constant 0 : index
        %66 = vector.load %arg13[%c0_44, %c0_45] : memref<8x1xf32, #tpu.memory_space<vmem>>, vector<8x1xf32>
        tpu.vector_store %arg13[%c0_44, %c0_45], %63 {strides = array<i32>} : memref<8x1xf32, #tpu.memory_space<vmem>>, vector<8x1xf32>,
        %c0_46 = arith.constant 0 : index
        %c0_47 = arith.constant 0 : index
        %67 = vector.load %arg14[%c0_46, %c0_47] : memref<8x1xf32, #tpu.memory_space<vmem>>, vector<8x1xf32>
        tpu.vector_store %arg14[%c0_46, %c0_47], %65 {strides = array<i32>} : memref<8x1xf32, #tpu.memory_space<vmem>>, vector<8x1xf32>,
      } else {
      }
      %c0_11 = arith.constant 0 : index
      %c0_12 = arith.constant 0 : index
      %19 = vector.load %arg13[%c0_11, %c0_12] : memref<8x1xf32, #tpu.memory_space<vmem>>, vector<8x1xf32>
      %20 = vector.broadcast %19 : vector<8x1xf32> to vector<8x256xf32>
      %21 = arith.mulf %10, %20 : vector<8x256xf32>
      %c0_13 = arith.constant 0 : index
      %c0_14 = arith.constant 0 : index
      %22 = vector.load %arg14[%c0_13, %c0_14] : memref<8x1xf32, #tpu.memory_space<vmem>>, vector<8x1xf32>
      %23 = vector.broadcast %22 : vector<8x1xf32> to vector<8x256xf32>
      %24 = arith.addf %21, %23 : vector<8x256xf32>
      %cst_15 = arith.constant 0.000000e+00 : f32
      %25 = vector.broadcast %cst_15 : f32 to vector<8x256xf32>
      %26 = arith.maximumf %24, %25 : vector<8x256xf32>
      %c0_16 = arith.constant 0 : index
      %c0_17 = arith.constant 0 : index
      %27 = vector.load %arg7[%c0_16, %c0_17] : memref<16x8xf32, #tpu.memory_space<vmem>>, vector<16x8xf32>
      %cst_18 = arith.constant dense<0.000000e+00> : vector<16x256xf32>
      %28 = tpu.matmul %27, %26, %cst_18 {dimension_numbers = #tpu.dot_dimension_numbers<[1], [0], [0], [1], [0, 0, 1, 1], [], []>} : vector<16x8xf32>, vector<8x256xf32>, vector<16x256xf32> -> vector<16x256xf32>
      %c0_19 = arith.constant 0 : index
      %c0_20 = arith.constant 0 : index
      %c0_21 = arith.constant 0 : index
      %29 = vector.load %arg8[%c0_19, %c0_20, %c0_21] : memref<1x16x256xf32, #tpu.memory_space<vmem>>, vector<1x16x256xf32>
      %30 = vector.shape_cast %29 : vector<1x16x256xf32> to vector<16x256xf32>
      %31 = vector.shape_cast %28 : vector<16x256xf32> to vector<1x16x256xf32>
      tpu.vector_store %arg8[%c0_19, %c0_20, %c0_21], %31 {strides = array<i32>} : memref<1x16x256xf32, #tpu.memory_space<vmem>>, vector<1x16x256xf32>,
      %c0_22 = arith.constant 0 : index
      %c0_23 = arith.constant 0 : index
      %32 = vector.load %arg9[%c0_22, %c0_23] : memref<16x128xf32, #tpu.memory_space<vmem>>, vector<16x128xf32>
      %c0_24 = arith.constant 0 : index
      %c0_25 = arith.constant 0 : index
      %33 = vector.load %arg10[%c0_24, %c0_25] : memref<16x128xf32, #tpu.memory_space<vmem>>, vector<16x128xf32>
      %34 = vector.extract_strided_slice %28 {offsets = [0, 0], sizes = [16, 128], strides = [1, 1]} : vector<16x256xf32> to vector<16x128xf32>
      %35 = arith.addf %32, %34 : vector<16x128xf32>
      %36 = arith.mulf %34, %34 : vector<16x128xf32>
      %37 = arith.addf %33, %36 : vector<16x128xf32>
      %38 = vector.extract_strided_slice %28 {offsets = [0, 128], sizes = [16, 128], strides = [1, 1]} : vector<16x256xf32> to vector<16x128xf32>
      %39 = arith.addf %35, %38 : vector<16x128xf32>
      %40 = arith.mulf %38, %38 : vector<16x128xf32>
      %41 = arith.addf %37, %40 : vector<16x128xf32>
      %c0_26 = arith.constant 0 : index
      %c0_27 = arith.constant 0 : index
      %42 = vector.load %arg9[%c0_26, %c0_27] : memref<16x128xf32, #tpu.memory_space<vmem>>, vector<16x128xf32>
      tpu.vector_store %arg9[%c0_26, %c0_27], %39 {strides = array<i32>} : memref<16x128xf32, #tpu.memory_space<vmem>>, vector<16x128xf32>,
      %c0_28 = arith.constant 0 : index
      %c0_29 = arith.constant 0 : index
      %43 = vector.load %arg10[%c0_28, %c0_29] : memref<16x128xf32, #tpu.memory_space<vmem>>, vector<16x128xf32>
      tpu.vector_store %arg10[%c0_28, %c0_29], %41 {strides = array<i32>} : memref<16x128xf32, #tpu.memory_space<vmem>>, vector<16x128xf32>,
    } else {
    }
    return
  }
  func.func @transform_0(%arg0: i32, %arg1: i32, %arg2: i32) -> (i32, i32, i32) {
    %c0_i32 = arith.constant 0 : i32
    %c0_i32_0 = arith.constant 0 : i32
    return %arg1, %c0_i32, %arg2 : i32, i32, i32
  }
  func.func @transform_1(%arg0: i32, %arg1: i32, %arg2: i32) -> (i32, i32) {
    %c0_i32 = arith.constant 0 : i32
    %c0_i32_0 = arith.constant 0 : i32
    %c0_i32_1 = arith.constant 0 : i32
    return %c0_i32, %c0_i32_0 : i32, i32
  }
  func.func @transform_2(%arg0: i32, %arg1: i32, %arg2: i32) -> (i32, i32) {
    %c0_i32 = arith.constant 0 : i32
    %c0_i32_0 = arith.constant 0 : i32
    %c0_i32_1 = arith.constant 0 : i32
    return %c0_i32, %c0_i32_0 : i32, i32
  }
  func.func @transform_3(%arg0: i32, %arg1: i32, %arg2: i32) -> (i32, i32) {
    %c0_i32 = arith.constant 0 : i32
    %c0_i32_0 = arith.constant 0 : i32
    %c0_i32_1 = arith.constant 0 : i32
    return %c0_i32, %c0_i32_0 : i32, i32
  }
  func.func @transform_4(%arg0: i32, %arg1: i32, %arg2: i32) -> (i32, i32) {
    %c0_i32 = arith.constant 0 : i32
    %c0_i32_0 = arith.constant 0 : i32
    %c0_i32_1 = arith.constant 0 : i32
    return %c0_i32, %c0_i32_0 : i32, i32
  }
  func.func @transform_5(%arg0: i32, %arg1: i32, %arg2: i32) -> (i32, i32, i32) {
    %0 = arith.muli %arg0, %arg1 : i32
    %1 = arith.muli %arg0, %arg2 : i32
    %c0_i32 = arith.constant 0 : i32
    %c0_i32_0 = arith.constant 0 : i32
    return %0, %c0_i32, %1 : i32, i32, i32
  }
  func.func @transform_6(%arg0: i32, %arg1: i32, %arg2: i32) -> (i32, i32) {
    %c0_i32 = arith.constant 0 : i32
    %c0_i32_0 = arith.constant 0 : i32
    %c0_i32_1 = arith.constant 0 : i32
    return %c0_i32, %c0_i32_0 : i32, i32
  }
  func.func @transform_7(%arg0: i32, %arg1: i32, %arg2: i32) -> (i32, i32) {
    %c0_i32 = arith.constant 0 : i32
    %c0_i32_0 = arith.constant 0 : i32
    %c0_i32_1 = arith.constant 0 : i32
    return %c0_i32, %c0_i32_0 : i32, i32
  }
}

module attributes {stable_mosaic.version = 11 : i64} {
  func.func @_bn2_fold_kernel(%arg0: i32, %arg1: i32, %arg2: memref<16x128xf32, #tpu.memory_space<vmem>>, %arg3: memref<16x128xf32, #tpu.memory_space<vmem>>, %arg4: memref<16x1xf32, #tpu.memory_space<vmem>>, %arg5: memref<16x1xf32, #tpu.memory_space<vmem>>, %arg6: memref<1x16x256xf32, #tpu.memory_space<vmem>>, %arg7: memref<1x16x256xf32, #tpu.memory_space<vmem>>) attributes {dimension_semantics = [#tpu.dimension_semantics<parallel>, #tpu.dimension_semantics<parallel>], iteration_bounds = array<i64: 2, 1>, scalar_prefetch = 0 : i64, scratch_operands = 0 : i64, tpu.core_type = #tpu.core_type<tc>, window_params = [{pipeline_mode = #tpu.pipeline_mode<synchronous>, transform_indices = @transform_0, window_bounds = array<i64: 16, 128>}, {pipeline_mode = #tpu.pipeline_mode<synchronous>, transform_indices = @transform_1, window_bounds = array<i64: 16, 128>}, {pipeline_mode = #tpu.pipeline_mode<synchronous>, transform_indices = @transform_2, window_bounds = array<i64: 16, 1>}, {pipeline_mode = #tpu.pipeline_mode<synchronous>, transform_indices = @transform_3, window_bounds = array<i64: 16, 1>}, {transform_indices = @transform_4, window_bounds = array<i64: 1, 16, 256>}, {transform_indices = @transform_5, window_bounds = array<i64: 1, 16, 256>}]} {
    %c0 = arith.constant 0 : index
    %c0_0 = arith.constant 0 : index
    %0 = vector.load %arg2[%c0, %c0_0] : memref<16x128xf32, #tpu.memory_space<vmem>>, vector<16x128xf32>
    %c0_1 = arith.constant 0 : index
    %c0_2 = arith.constant 0 : index
    %1 = vector.load %arg3[%c0_1, %c0_2] : memref<16x128xf32, #tpu.memory_space<vmem>>, vector<16x128xf32>
    %c0_3 = arith.constant 0 : index
    %c0_4 = arith.constant 0 : index
    %2 = vector.load %arg4[%c0_3, %c0_4] : memref<16x1xf32, #tpu.memory_space<vmem>>, vector<16x1xf32>
    %c0_5 = arith.constant 0 : index
    %c0_6 = arith.constant 0 : index
    %3 = vector.load %arg5[%c0_5, %c0_6] : memref<16x1xf32, #tpu.memory_space<vmem>>, vector<16x1xf32>
    %cst = arith.constant dense<0.000000e+00> : vector<16xf32>
    %4 = vector.multi_reduction <add>, %0, %cst [1] : vector<16x128xf32> to vector<16xf32>
    %5 = vector.shape_cast %4 : vector<16xf32> to vector<16x1xf32>
    %cst_7 = arith.constant 0.001953125 : f32
    %6 = vector.broadcast %cst_7 : f32 to vector<16x1xf32>
    %7 = arith.mulf %5, %6 : vector<16x1xf32>
    %cst_8 = arith.constant dense<0.000000e+00> : vector<16xf32>
    %8 = vector.multi_reduction <add>, %1, %cst_8 [1] : vector<16x128xf32> to vector<16xf32>
    %9 = vector.shape_cast %8 : vector<16xf32> to vector<16x1xf32>
    %cst_9 = arith.constant 0.001953125 : f32
    %10 = vector.broadcast %cst_9 : f32 to vector<16x1xf32>
    %11 = arith.mulf %9, %10 : vector<16x1xf32>
    %12 = arith.mulf %7, %7 : vector<16x1xf32>
    %13 = arith.subf %11, %12 : vector<16x1xf32>
    %cst_10 = arith.constant 0.000000e+00 : f32
    %14 = vector.broadcast %cst_10 : f32 to vector<16x1xf32>
    %15 = arith.maximumf %13, %14 : vector<16x1xf32>
    %cst_11 = arith.constant 9.99999974E-6 : f32
    %16 = vector.broadcast %cst_11 : f32 to vector<16x1xf32>
    %17 = arith.addf %15, %16 : vector<16x1xf32>
    %18 = math.rsqrt %17 : vector<16x1xf32>
    %19 = arith.mulf %2, %18 : vector<16x1xf32>
    %20 = arith.mulf %7, %19 : vector<16x1xf32>
    %21 = arith.subf %3, %20 : vector<16x1xf32>
    %c0_12 = arith.constant 0 : index
    %c0_13 = arith.constant 0 : index
    %c0_14 = arith.constant 0 : index
    %22 = vector.load %arg6[%c0_12, %c0_13, %c0_14] : memref<1x16x256xf32, #tpu.memory_space<vmem>>, vector<1x16x256xf32>
    %23 = vector.shape_cast %22 : vector<1x16x256xf32> to vector<16x256xf32>
    %24 = vector.broadcast %19 : vector<16x1xf32> to vector<16x256xf32>
    %25 = arith.mulf %23, %24 : vector<16x256xf32>
    %26 = vector.broadcast %21 : vector<16x1xf32> to vector<16x256xf32>
    %27 = arith.addf %25, %26 : vector<16x256xf32>
    %c0_15 = arith.constant 0 : index
    %c0_16 = arith.constant 0 : index
    %c0_17 = arith.constant 0 : index
    %28 = vector.load %arg7[%c0_15, %c0_16, %c0_17] : memref<1x16x256xf32, #tpu.memory_space<vmem>>, vector<1x16x256xf32>
    %29 = vector.shape_cast %28 : vector<1x16x256xf32> to vector<16x256xf32>
    %30 = vector.shape_cast %27 : vector<16x256xf32> to vector<1x16x256xf32>
    tpu.vector_store %arg7[%c0_15, %c0_16, %c0_17], %30 {strides = array<i32>} : memref<1x16x256xf32, #tpu.memory_space<vmem>>, vector<1x16x256xf32>,
    return
  }
  func.func @transform_0(%arg0: i32, %arg1: i32) -> (i32, i32) {
    %c0_i32 = arith.constant 0 : i32
    %c0_i32_0 = arith.constant 0 : i32
    %c0_i32_1 = arith.constant 0 : i32
    return %c0_i32, %c0_i32_0 : i32, i32
  }
  func.func @transform_1(%arg0: i32, %arg1: i32) -> (i32, i32) {
    %c0_i32 = arith.constant 0 : i32
    %c0_i32_0 = arith.constant 0 : i32
    %c0_i32_1 = arith.constant 0 : i32
    return %c0_i32, %c0_i32_0 : i32, i32
  }
  func.func @transform_2(%arg0: i32, %arg1: i32) -> (i32, i32) {
    %c0_i32 = arith.constant 0 : i32
    %c0_i32_0 = arith.constant 0 : i32
    %c0_i32_1 = arith.constant 0 : i32
    return %c0_i32, %c0_i32_0 : i32, i32
  }
  func.func @transform_3(%arg0: i32, %arg1: i32) -> (i32, i32) {
    %c0_i32 = arith.constant 0 : i32
    %c0_i32_0 = arith.constant 0 : i32
    %c0_i32_1 = arith.constant 0 : i32
    return %c0_i32, %c0_i32_0 : i32, i32
  }
  func.func @transform_4(%arg0: i32, %arg1: i32) -> (i32, i32, i32) {
    %c0_i32 = arith.constant 0 : i32
    %c0_i32_0 = arith.constant 0 : i32
    return %arg0, %c0_i32, %arg1 : i32, i32, i32
  }
  func.func @transform_5(%arg0: i32, %arg1: i32) -> (i32, i32, i32) {
    %c0_i32 = arith.constant 0 : i32
    %c0_i32_0 = arith.constant 0 : i32
    return %arg0, %c0_i32, %arg1 : i32, i32, i32
  }
}

</mosaic_0001>

<bundles_post_ra>
// kernel: projection_head.3
= control target key start
LH: loop header
LB: loop body
LE: loop exit
PB: predicated region body
PF: predicated region fallthrough
CT: control target
= control target key end

     0   :  { %s522_s18 = smov 0   ;;  %s524_s19 = smov 0   ;;  %s583_s0 = inlined_call_operand.vmem [shape: f32[16,128], index: 0, kind: input, shape index: {}]   ;;  %s584_s1 = inlined_call_operand.vmem [shape: f32[16,128], index: 1, kind: input, shape index: {}]   ;;  %s585_s2 = inlined_call_operand.vmem [shape: f32[16,1], index: 2, kind: input, shape index: {}]   ;;  %s586_s3 = inlined_call_operand.vmem [shape: f32[16,1], index: 3, kind: input, shape index: {}]   ;;  %s587_s4 = inlined_call_operand.vmem [shape: f32[2,16,256], index: 4, kind: input, shape index: {}, may-alias: {4,5}]   ;;  %s588_s5 = inlined_call_operand.vmem [shape: f32[2,16,256], index: 5, kind: output, shape index: {}, may-alias: {4,5}]  }
   0x1   :  { %s526_s20 = smov 0  }
   0x2 LB: > { %s27_s21 = sadd.s32 1, %s485_s19  ;;  %p427_p0 = scmp.ge.s32.totalorder %s489_s20, 1  ;;  %s489_s20 = sphi %s526_s20, %s15_s20   ;;  %s485_s19 = sphi %s524_s19, %s590_s19   ;;  %s481_s18 = sphi %s522_s18, %s589_s18  }
   0x3   : > { %p29_p1 = scmp.ge.s32.totalorder %s27_s21, 2  ;;  %p208_p2 = scmp.lt.s32.totalorder %s489_s20, 3 }
   0x5   : > { %s592_s21 = smov (%p29_p1, %s27_s21), 0  ;;  %p209_p3 = pnand %p427_p0, %p208_p2 }
   0x6   : > { %v264_v0 = vld [vmem:[%s583_s0] sm:$0xff] (!%p209_p3)  ;;  %v265_v2 = vld [vmem:[%s583_s0 + $0x8] sm:$0xff] (!%p209_p3)  ;;  %v491_v4 = vmov (!%p209_p3), 0   ;;  %p245_p4 = scmp.lt.s32.totalorder (!%p209_p3), %s481_s18, 1 }
   0x7   : > { %212 = sbr.rel (%p209_p3) target bundleno = 315 (0x13b), region = 40  ;;  %v266_v1 = vld [vmem:[%s584_s1] sm:$0xff] (!%p209_p3)  ;;  %272 = vadd.xlane.f32.xlu0 (!%p209_p3), %v264_v0  ;;  %v267_v3 = vld [vmem:[%s584_s1 + $0x8] sm:$0xff] (!%p209_p3)  ;;  %462 = vset.pattern.permute.xlu1 (!%p209_p3), %v491_v4 }
   0x8   : > { %278 = vadd.xlane.f32.xlu1 (!%p209_p3), %v266_v1  ;;  %461 = vset.pattern.permute.xlu0 (!%p209_p3), %v491_v4  ;;  %v268_v21 = vld [vmem:[%s585_s2] sm:$0xff] (!%p209_p3)  ;;  %v269_v24 = vld [vmem:[%s585_s2 + $0x8] sm:$0xff] (!%p209_p3) }
   0x9   : > { %v270_v28 = vld [vmem:[%s586_s3] sm:$0xff] (!%p209_p3)  ;;  %v271_v31 = vld [vmem:[%s586_s3 + $0x8] sm:$0xff] (!%p209_p3) }
   0xb   : > { %274 = vadd.xlane.f32.xlu0 (!%p209_p3), %v265_v2 }
   0xc   : > { %280 = vadd.xlane.f32.xlu1 (!%p209_p3), %v267_v3 }
   0xe   : > { %s594_s18 = smov (!%p245_p4, %s481_s18), 1 }
   0xf   : > { %s434_s13 = sshll.u32 %s594_s18, 5 }
  0x10   : > { %s252_s16 = scalar_lea.vmem %s587_s4, %s434_s13  ;;  %s262_s23 = scalar_lea.vmem %s588_s5, %s434_s13 }
  0x11   : > { %v300_v34 = vld [vmem:[%s252_s16] sm:$0xff]  ;;  %v301_v35 = vld [vmem:[%s252_s16 + $0x8] sm:$0xff]  ;;  %v302_v39 = vld [vmem:[%s252_s16 + $0x10] sm:$0xff] }
  0x12   : > { %v303_v40 = vld [vmem:[%s252_s16 + $0x18] sm:$0xff] }
  0x94   : > { %v273_v5 = vpop.xlane.xlu0 %272 }
  0x95   : > { %v279_v6 = vpop.xlane.xlu1 %278  ;;  %v276_v7 = vmul.f32 0.001953125, %v273_v5 }
  0x96   : > { %v282_v8 = vmul.f32 0.001953125, %v279_v6 }
  0x97   : > { %v284_v9 = vmul.f32 %v276_v7, %v276_v7 }
  0x98   : > { %v275_v10 = vpop.xlane.xlu0 %274 }
  0x99   : > { %v281_v11 = vpop.xlane.xlu1 %280  ;;  %v286_v12 = vsub.f32 %v282_v8, %v284_v9  ;;  %v277_v13 = vmul.f32 0.001953125, %v275_v10 }
  0x9a   : > { %v283_v14 = vmul.f32 0.001953125, %v281_v11 }
  0x9b   : > { %v288_v15 = vmax.f32 %v286_v12, 0.0  ;;  %v285_v16 = vmul.f32 %v277_v13, %v277_v13 }
  0x9d   : > { %v290_v17 = vadd.f32 1e-05, %v288_v15  ;;  %v287_v18 = vsub.f32 %v283_v14, %v285_v16 }
  0x9f   : > { %463 = vrsqrt.f32 %v290_v17  ;;  %v289_v19 = vmax.f32 %v287_v18, 0.0 }
  0xa1   : > { %v291_v20 = vadd.f32 1e-05, %v289_v19 }
  0xa3   : > { %465 = vrsqrt.f32 %v291_v20 }
  0xa9   : > { %v464_v22 = vpop.eup %463 }
  0xaa   : > { %v294_v23 = vmul.f32 %v464_v22, %v268_v21 }
  0xac   : > { %306 = vperm.xlu0 %461, %v294_v23   ;;  %v296_v27 = vmul.f32 %v294_v23, %v276_v7 }
  0xad   : > { %v466_v25 = vpop.eup %465 }
  0xae   : > { %v295_v26 = vmul.f32 %v466_v25, %v269_v24  ;;  %v298_v29 = vsub.f32 %v270_v28, %v296_v27 }
  0xb0   : > { %311 = vperm.xlu1 %462, %v295_v26   ;;  %v297_v30 = vmul.f32 %v295_v26, %v277_v13 }
  0xb2   : > { %v299_v32 = vsub.f32 %v271_v31, %v297_v30 }
  0xb4   : > { %320 = vperm.xlu1 %462, %v298_v29  }
  0xb8   : > { %325 = vperm.xlu1 %462, %v299_v32  }
 0x12b   : > { %v307_v33 = vpop.permute.xlu0 %306 }
 0x12c   : > { %v314_v37 = vmul.f32 %v307_v33, %v300_v34  ;;  %v315_v38 = vmul.f32 %v307_v33, %v301_v35 }
 0x12f   : > { %v312_v36 = vpop.permute.xlu1 %311 }
 0x130   : > { %v316_v44 = vmul.f32 %v312_v36, %v302_v39  ;;  %v317_v45 = vmul.f32 %v312_v36, %v303_v40 }
 0x133   : > { %v321_v41 = vpop.permute.xlu1 %320 }
 0x134   : > { %v328_v42 = vadd.f32 %v321_v41, %v314_v37  ;;  %v329_v43 = vadd.f32 %v321_v41, %v315_v38 }
 0x136   : > { %332 = vst [vmem:[%s262_s23] sm:$0xff] %v328_v42  ;;  %333 = vst [vmem:[%s262_s23 + $0x8] sm:$0xff] %v329_v43 }
 0x137   : > { %v326_v46 = vpop.permute.xlu1 %325 }
 0x138   : > { %v330_v47 = vadd.f32 %v326_v46, %v316_v44  ;;  %v331_v48 = vadd.f32 %v326_v46, %v317_v45 }
 0x13a   : > { %334 = vst [vmem:[%s262_s23 + $0x10] sm:$0xff] %v330_v47  ;;  %335 = vst [vmem:[%s262_s23 + $0x18] sm:$0xff] %v331_v48 }
 0x13b PF: > { %s15_s20 = sadd.s32 1, %s489_s20   ;;  %s589_s18 = smov %s485_s19 }
 0x13c   : > { %p12_p5 = scmp.ge.s32.totalorder %s15_s20, 4   ;;  %s590_s19 = smov %s592_s21 }
 0x13e   :  { %14 = sbr.rel (!%p12_p5) target bundleno = 2 (0x2), region = 70 }

// kernel: projection_head.2
= control target key start
LH: loop header
LB: loop body
LE: loop exit
PB: predicated region body
PF: predicated region fallthrough
CT: control target
= control target key end

     0   :  { %s864_s24 = smov 0   ;;  %s866_s25 = smov 0   ;;  %s988_s0 = inlined_call_operand.vmem [shape: f32[2,4,256], index: 0, kind: input, shape index: {}]   ;;  %s989_s1 = inlined_call_operand.vmem [shape: f32[8,4], index: 1, kind: input, shape index: {}]   ;;  %s990_s2 = inlined_call_operand.vmem [shape: f32[8,1], index: 2, kind: input, shape index: {}]   ;;  %s991_s3 = inlined_call_operand.vmem [shape: f32[8,1], index: 3, kind: input, shape index: {}]   ;;  %s992_s4 = inlined_call_operand.vmem [shape: f32[16,8], index: 4, kind: input, shape index: {}]   ;;  %s993_s5 = inlined_call_operand.vmem [shape: f32[2,16,256], index: 5, kind: output, shape index: {0}]   ;;  %s994_s6 = inlined_call_operand.vmem [shape: f32[16,128], index: 6, kind: output, shape index: {1}]   ;;  %s995_s7 = inlined_call_operand.vmem [shape: f32[16,128], index: 7, kind: output, shape index: {2}]  }
   0x1   :  { %s868_s26 = smov 0   ;;  %s870_s27 = smov 0  }
   0x2   :  { %s872_s28 = smov 0  }
   0x3 LB: > { %s33_s29 = sadd.s32 1, %s810_s26  ;;  %s37_s30 = sadd.s32 1, %s814_s27  ;;  %s818_s28 = sphi %s872_s28, %s18_s28   ;;  %s814_s27 = sphi %s870_s27, %s999_s27   ;;  %s810_s26 = sphi %s868_s26, %s998_s26   ;;  %s806_s25 = sphi %s866_s25, %s997_s25   ;;  %s802_s24 = sphi %s864_s24, %s996_s24  }
   0x4   : > { %p35_p0 = scmp.ge.s32.totalorder %s33_s29, 2  ;;  %p712_p1 = scmp.ge.s32.totalorder %s818_s28, 1 }
   0x5   : > { %p264_p2 = scmp.lt.s32.totalorder %s818_s28, 5 }
   0x6   : > { %s1001_s29 = smov (%p35_p0, %s33_s29), 0  ;;  %s1003_s30 = smov (!%p35_p0, %s37_s30), %s814_s27 }
   0x7   : > { %p265_p3 = pnand %p712_p1, %p264_p2  ;;  %p39_p4 = scmp.ge.s32.totalorder %s1003_s30, 2 }
   0x8   : > { %p307_p5 = scmp.lt.s32.totalorder (!%p265_p3), %s802_s24, 1  ;;  %s316_s8 = smul.u32 (!%p265_p3), %s802_s24, %s806_s25 }
   0x9   : > { %s1005_s30 = smov (%p39_p4, %s1003_s30), 0  ;;  %268 = sbr.rel (%p265_p3) target bundleno = 791 (0x317), region = 40 }
   0xa   : > { %p330_p6 = scmp.eq.s32.totalorder (!%p265_p3), %s802_s24, 0  ;;  %p334_p7 = scmp.eq.s32.totalorder (!%p265_p3), %s806_s25, 0 }
   0xb   : > { %p319_p8 = scmp.lt.s32.totalorder (!%p265_p3), %s316_s8, 1 }
   0xc   : > { %p335_p9 = pnand (!%p265_p3), %p334_p7, %p330_p6 }
  0x10   : > { %s308_s9 = scalar_select %p307_p5, %s802_s24, 1 }
  0x11   : > { %s1007_s8 = smov (!%p319_p8, %s316_s8), 1  ;;  %338 = sbr.rel (%p335_p9) target bundleno = 24 (0x18), region = 44 }
  0x12   : > { %s727_s10 = sshll.u32 %s308_s9, 3  ;;  %s728_s14 = sshll.u32 %s1007_s8, 5  ;;  %v820_v0 = vmov (!%p335_p9), 0.0  }
  0x13   : > { %s314_s13 = scalar_lea.vmem %s988_s0, %s727_s10  ;;  %s912_s17 = scalar_lea.vmem %s993_s5, %s728_s14  ;;  %339 = vst [vmem:[#allocation2] sm:$0xff] (!%p335_p9), %v820_v0  ;;  %340 = vst [vmem:[#allocation3] sm:$0xff] (!%p335_p9), %v820_v0 }
  0x14   : > { %341 = vst [vmem:[%s994_s6] sm:$0xff] (!%p335_p9), %v820_v0  ;;  %342 = vst [vmem:[%s994_s6 + $0x8] sm:$0xff] (!%p335_p9), %v820_v0 }
  0x15   : > { %343 = vst [vmem:[%s995_s7] sm:$0xff] (!%p335_p9), %v820_v0  ;;  %344 = vst [vmem:[%s995_s7 + $0x8] sm:$0xff] (!%p335_p9), %v820_v0 }
  0x18 PF: > { %v346_v1 = vld [vmem:[%s314_s13] sm:$0xff]  ;;  %vm353_vm0 = vcmask 1043456   ;;  %v821_v3 = vmov 0.0   ;;  %vm349_vm1 = vcmask 31744   ;;  %p721_p10 = scmp.ne.s32.totalorder %s806_s25, 0 }
  0x19   : > { %v348_v2 = vcombine.high %v346_v1, %v346_v1  ;;  %422 = vmatprep.mubr.f32.mxu0 %v821_v3  ;;  %v345_v4 = vld [vmem:[%s989_s1] sm:$0xff] }
  0x1a   : > { %v432_v7 = vld [vmem:[#allocation2] sm:$0xff] (!%p721_p10)  ;;  %v433_v8 = vld [vmem:[#allocation3] sm:$0xff] (!%p721_p10) }
  0x1b   : > { %718 = vmatprep.subr.msk.mxu0 %vm353_vm0, %v348_v2 }
  0x1c   : > { %719 = vmatpush1.msk.msra.mxu0 %vm353_vm0, %v346_v1 }
  0x1d   : > { %720 = vmatmul.mubr.msk.f32.vlgmr.msra.gmra.mrb[0].mxu0 %vm349_vm1, %v345_v4 }
  0xeb   : > { %431 = sbr.rel (%p721_p10) target bundleno = 248 (0xf8), region = 48 }
  0xf0   : > { %v424_v5 = vpop.f32.mrb[0].mxu0 }
  0xf1   : > { %v426_v6 = vpop.f32.mrb[1].mxu0  ;;  %v435_v9 = vmul.f32 (!%p721_p10), %v424_v5, %v424_v5  ;;  %v434_v11 = vadd.f32 (!%p721_p10), %v432_v7, %v424_v5 }
  0xf2   : > { %v438_v10 = vmul.f32 %v426_v6, %v426_v6 }
  0xf3   : > { %v436_v12 = vadd.f32 %v435_v9, %v433_v8  ;;  %v437_v13 = vadd.f32 %v434_v11, %v426_v6 }
  0xf5   : > { %v439_v14 = vadd.f32 %v438_v10, %v436_v12  ;;  %440 = vst [vmem:[#allocation2] sm:$0xff] %v437_v13 }
  0xf7   : > { %441 = vst [vmem:[#allocation3] sm:$0xff] %v439_v14 }
  0xf8 PF: > { %p722_p11 = scmp.ne.s32.totalorder %s806_s25, 1 }
  0xfa   : > { %445 = sbr.rel (%p722_p11) target bundleno = 791 (0x317), region = 52 }
 0x101   : > { %447 = sbr.rel (!%p330_p6) target bundleno = 430 (0x1ae), region = 56  ;;  %v448_v15 = vld [vmem:[#allocation2] sm:$0xff] (%p330_p6)  ;;  %v449_v16 = vld [vmem:[#allocation3] sm:$0xff] (%p330_p6)  ;;  %vm466_vm2 = vcmask (%p330_p6), 7168  }
 0x102   : > { %452 = vadd.xlane.f32.xlu0 (%p330_p6), %v448_v15  ;;  %v450_v25 = vld [vmem:[%s990_s2] sm:$0xff] (%p330_p6) }
 0x103   : > { %v451_v28 = vld [vmem:[%s991_s3] sm:$0xff] (%p330_p6) }
 0x106   : > { %455 = vadd.xlane.f32.xlu0 (%p330_p6), %v449_v16 }
 0x18f   : > { %v453_v17 = vpop.xlane.xlu0 %452 }
 0x190   : > { %v454_v18 = vmul.f32 0.001953125, %v453_v17 }
 0x192   : > { %v458_v20 = vmul.f32 %v454_v18, %v454_v18 }
 0x193   : > { %v456_v19 = vpop.xlane.xlu0 %455 }
 0x194   : > { %v457_v21 = vmul.f32 0.001953125, %v456_v19 }
 0x196   : > { %v459_v22 = vsub.f32 %v457_v21, %v458_v20 }
 0x198   : > { %v460_v23 = vmax.f32 %v459_v22, 0.0 }
 0x19a   : > { %v461_v24 = vadd.f32 1e-05, %v460_v23 }
 0x19c   : > { %777 = vrsqrt.f32 %v461_v24 }
 0x1a6   : > { %v778_v26 = vpop.eup %777 }
 0x1a7   : > { %v463_v27 = vmul.f32 %v778_v26, %v450_v25 }
 0x1a9   : > { %v464_v29 = vmul.f32 %v463_v27, %v454_v18  ;;  %467 = vst.msk [vmem:[#allocation4] sm:$0xff] %vm466_vm2, %v463_v27 }
 0x1ab   : > { %v465_v30 = vsub.f32 %v451_v28, %v464_v29 }
 0x1ad   : > { %468 = vst.msk [vmem:[#allocation5] sm:$0xff] %vm466_vm2, %v465_v30 }
 0x1ae PF: > { %v822_v32 = vmov 0   ;;  %v823_v34 = vmov 0.0   ;;  %v487_v43 = vld [vmem:[%s992_s4] sm:$0xff]  ;;  %vm489_vm3 = vcmask 64512   ;;  %v488_v44 = vld [vmem:[%s992_s4 + $0x8] sm:$0xff] }
 0x1af   : > { %779 = vset.pattern.permute.xlu0 %v822_v32  ;;  %560 = vmatprep.mubr.f32.mxu0 %v823_v34  ;;  %v577_v45 = vld [vmem:[%s994_s6] sm:$0xff]  ;;  %v578_v46 = vld [vmem:[%s994_s6 + $0x8] sm:$0xff] }
 0x1b0   : > { %v469_v31 = vld [vmem:[#allocation4] sm:$0xff]  ;;  %566 = vmatprep.mubr.f32.mxu1 %v823_v34  ;;  %v579_v48 = vld [vmem:[%s995_s7] sm:$0xff]  ;;  %v580_v50 = vld [vmem:[%s995_s7 + $0x8] sm:$0xff] }
 0x1b1   : > { %472 = vperm.xlu0 %779, %v469_v31  }
 0x1b4   : > { %v477_v33 = vld [vmem:[#allocation5] sm:$0xff] }
 0x1b5   : > { %480 = vperm.xlu0 %779, %v477_v33  }
 0x230   : > { %v473_v35 = vpop.permute.xlu0 %472 }
 0x231   : > { %v475_v36 = vmul.f32 %v473_v35, %v424_v5  ;;  %v476_v37 = vmul.f32 %v473_v35, %v426_v6 }
 0x234   : > { %v481_v38 = vpop.permute.xlu0 %480 }
 0x235   : > { %v483_v39 = vadd.f32 %v481_v38, %v475_v36  ;;  %v484_v40 = vadd.f32 %v481_v38, %v476_v37 }
 0x237   : > { %v485_v41 = vmax.f32 %v483_v39, 0.0  ;;  %v486_v42 = vmax.f32 %v484_v40, 0.0 }
 0x239   : > { %496 = vmatprep.subr.mxu0 %v486_v42  ;;  %730 = vmatprep.subr.mxu1 %v486_v42 }
 0x23a   : > { %497 = vmatpush1.msra.mxu0 %v485_v41  ;;  %731 = vmatpush1.msra.mxu1 %v485_v41 }
 0x23b   : > { %723 = vmatmul.mubr.msk.f32.vlgmr.msra.gmra.mrb[0].mxu0 %vm489_vm3, %v487_v43  ;;  %724 = vmatmul.mubr.msk.f32.vlgmr.msra.gmra.mrb[0].mxu1 %vm489_vm3, %v488_v44 }
 0x30e   : > { %v562_v47 = vpop.f32.mrb[0].mxu0  ;;  %v568_v49 = vpop.f32.mrb[0].mxu1 }
 0x30f   : > { %573 = vst [vmem:[%s912_s17] sm:$0xff] %v562_v47  ;;  %v581_v51 = vadd.f32 %v577_v45, %v562_v47  ;;  %v583_v52 = vmul.f32 %v562_v47, %v562_v47  ;;  %575 = vst [vmem:[%s912_s17 + $0x10] sm:$0xff] %v568_v49  ;;  %v582_v53 = vadd.f32 %v578_v46, %v568_v49  ;;  %v564_v55 = vpop.f32.mrb[1].mxu0  ;;  %v570_v56 = vpop.f32.mrb[1].mxu1 }
 0x310   : > { %v584_v54 = vmul.f32 %v568_v49, %v568_v49  ;;  %574 = vst [vmem:[%s912_s17 + $0x8] sm:$0xff] %v564_v55  ;;  %v589_v57 = vmul.f32 %v564_v55, %v564_v55  ;;  %576 = vst [vmem:[%s912_s17 + $0x18] sm:$0xff] %v570_v56  ;;  %v590_v58 = vmul.f32 %v570_v56, %v570_v56 }
 0x311   : > { %v585_v59 = vadd.f32 %v583_v52, %v579_v48  ;;  %v587_v61 = vadd.f32 %v581_v51, %v564_v55  ;;  %v588_v62 = vadd.f32 %v582_v53, %v570_v56 }
 0x312   : > { %v586_v60 = vadd.f32 %v584_v54, %v580_v50 }
 0x313   : > { %v591_v63 = vadd.f32 %v589_v57, %v585_v59  ;;  %593 = vst [vmem:[%s994_s6] sm:$0xff] %v587_v61  ;;  %594 = vst [vmem:[%s994_s6 + $0x8] sm:$0xff] %v588_v62 }
 0x314   : > { %v592_v0 = vadd.f32 %v590_v58, %v586_v60 }
 0x315   : > { %595 = vst [vmem:[%s995_s7] sm:$0xff] %v591_v63 }
 0x316   : > { %596 = vst [vmem:[%s995_s7 + $0x8] sm:$0xff] %v592_v0 }
 0x317 PF: > { %s18_s28 = sadd.s32 1, %s818_s28   ;;  %s996_s24 = smov %s810_s26 }
 0x318   : > { %p15_p12 = scmp.ge.s32.totalorder %s18_s28, 6   ;;  %s997_s25 = smov %s814_s27 }
 0x319   : > { %s998_s26 = smov %s1001_s29  ;;  %s999_s27 = smov %s1005_s30 }
 0x31a   :  { %17 = sbr.rel (!%p15_p12) target bundleno = 3 (0x3), region = 102 }

</bundles_post_ra>
